<compile_context>
chip_gen: v5e
topology: v5e:2x2
jax: 0.10.0
libtpu: 0.0.40
codegen_flags: <defaults>
</compile_context>

<pallas_src>
import math
import jax
import jax.numpy as jnp
from jax.experimental import pallas as pl
from jax.experimental.pallas import tpu as pltpu


LAYER_DIMS = [(6, 64), (64, 128), (128, 512), (512, 128), (128, 64), (64, 3)]
LANE_PAD = 128          # lane-dense output width
TM = 1024               # batch tile (multiple of 8; comfortably fits v7x VMEM)
NO_GRID_MAX_B = 4096    # below this, skip the grid machinery entirely


def agent_kernel(x_ref, w_ref, b_ref, o_ref):
    """y = sigmoid(x @ W_eff + b_eff), lane-padded to 128 output columns."""
    h = jnp.dot(x_ref[...], w_ref[...],
                preferred_element_type=jnp.float32) + b_ref[...]
    # exp on the EUP; exact reciprocal keeps us bit-close to the reference.
    o_ref[...] = pl.reciprocal(1.0 + jnp.exp(-h), approx=False)


def fold_affine(params):
    """Collapse the six Linear layers into one (W_eff, b_eff), lane-padded."""
    w_eff, b_eff = params[0]
    for w, b in params[1:]:
        w_eff = w_eff @ w
        b_eff = b_eff @ w + b
    out_dim = w_eff.shape[1]
    w_pad = jnp.zeros((w_eff.shape[0], LANE_PAD), jnp.float32)
    w_pad = w_pad.at[:, :out_dim].set(w_eff)
    b_pad = jnp.zeros((1, LANE_PAD), jnp.float32)
    b_pad = b_pad.at[:, :out_dim].set(b_eff)
    return w_pad, b_pad, out_dim


def agent_forward(x, w_pad, b_pad, out_dim):
    """x: f32[B, 6]; w_pad: f32[6, 128]; b_pad: f32[1, 128] -> f32[B, out_dim]."""
    B, K = x.shape
    N = w_pad.shape[1]

    if B <= NO_GRID_MAX_B:
        # Single-shot: whole arrays live in VMEM, no grid / pipeline overhead.
        out = pl.pallas_call(
            agent_kernel,
            out_shape=jax.ShapeDtypeStruct((B, N), jnp.float32),
            in_specs=[pl.BlockSpec(memory_space=pltpu.MemorySpace.VMEM)] * 3,
            out_specs=pl.BlockSpec(memory_space=pltpu.MemorySpace.VMEM),
        )(x, w_pad, b_pad)
        return out[:, :out_dim]

    # Large batch: tile the batch axis; weights/bias stay VMEM-resident.
    B_pad = pl.cdiv(B, TM) * TM
    if B_pad != B:
        x = jnp.pad(x, ((0, B_pad - B), (0, 0)))
    out = pl.pallas_call(
        agent_kernel,
        out_shape=jax.ShapeDtypeStruct((B_pad, N), jnp.float32),
        grid=(B_pad // TM,),
        in_specs=[
            pl.BlockSpec((TM, K), lambda i: (i, 0)),
            pl.BlockSpec((K, N), lambda i: (0, 0)),
            pl.BlockSpec((1, N), lambda i: (0, 0)),
        ],
        out_specs=pl.BlockSpec((TM, N), lambda i: (i, 0)),
        compiler_params=pltpu.CompilerParams(
            dimension_semantics=("parallel",),   # shards across TCs on v7x
        ),
    )(x, w_pad, b_pad)
    return out[:B, :out_dim]


def init_params(key):
    """Deterministic init mimicking torch.nn.Linear default (U[-1/sqrt(fan_in), +])."""
    params = []
    for (fan_in, fan_out) in LAYER_DIMS:
        key, kw, kb = jax.random.split(key, 3)
        bound = 1.0 / math.sqrt(fan_in)
        # Stored transposed relative to PyTorch: [in, out]
        w = jax.random.uniform(kw, (fan_in, fan_out), jnp.float32, -bound, bound)
        b = jax.random.uniform(kb, (1, fan_out), jnp.float32, -bound, bound)
        params.append((w, b))
    return params


def agent_reference(x, params):
    """Plain-JAX, layer-by-layer reference matching the PyTorch forward."""
    h = x
    for w, b in params:
        h = h @ w + b
    return jax.nn.sigmoid(h)


if __name__ == "__main__":
    key = jax.random.PRNGKey(0)
    key, kx = jax.random.split(key)

    B = 8
    x = jax.random.normal(kx, (B, 6), jnp.float32)
    params = init_params(key)

    # Fold the six Linear layers once (outside the kernel).
    w_pad, b_pad, out_dim = fold_affine(params)

    # Small-batch (no-grid) path.
    out = jax.block_until_ready(agent_forward(x, w_pad, b_pad, out_dim))
    ref = agent_reference(x, params)
    assert out.shape == (B, 3)
    assert jnp.allclose(out, ref, atol=2e-5, rtol=2e-5), "small-batch mismatch"

    # Also exercise the batch-tiled (grid) path with a non-multiple batch.
    key, kx2 = jax.random.split(key)
    B2 = 4100
    x2 = jax.random.normal(kx2, (B2, 6), jnp.float32)
    out2 = jax.block_until_ready(agent_forward(x2, w_pad, b_pad, out_dim))
    ref2 = agent_reference(x2, params)
    assert out2.shape == (B2, 3)
    assert jnp.allclose(out2, ref2, atol=2e-5, rtol=2e-5), "tiled-batch mismatch"

    print("KERNEL_OK")
</pallas_src>

<mosaic_0001>
module attributes {stable_mosaic.version = 11 : i64} {
  func.func @agent_kernel(%arg0: memref<8x6xf32, #tpu.memory_space<vmem>>, %arg1: memref<6x128xf32, #tpu.memory_space<vmem>>, %arg2: memref<1x128xf32, #tpu.memory_space<vmem>>, %arg3: memref<8x128xf32, #tpu.memory_space<vmem>>) attributes {dimension_semantics = [], scalar_prefetch = 0 : i64, scratch_operands = 0 : i64, tpu.core_type = #tpu.core_type<tc>} {
    %c0 = arith.constant 0 : index
    %c0_0 = arith.constant 0 : index
    %0 = vector.load %arg0[%c0, %c0_0] : memref<8x6xf32, #tpu.memory_space<vmem>>, vector<8x6xf32>
    %c0_1 = arith.constant 0 : index
    %c0_2 = arith.constant 0 : index
    %1 = vector.load %arg1[%c0_1, %c0_2] : memref<6x128xf32, #tpu.memory_space<vmem>>, vector<6x128xf32>
    %cst = arith.constant dense<0.000000e+00> : vector<8x128xf32>
    %2 = tpu.matmul %0, %1, %cst {dimension_numbers = #tpu.dot_dimension_numbers<[1], [0], [0], [1], [0, 0, 1, 1], [], []>} : vector<8x6xf32>, vector<6x128xf32>, vector<8x128xf32> -> vector<8x128xf32>
    %c0_3 = arith.constant 0 : index
    %c0_4 = arith.constant 0 : index
    %3 = vector.load %arg2[%c0_3, %c0_4] : memref<1x128xf32, #tpu.memory_space<vmem>>, vector<1x128xf32>
    %4 = vector.broadcast %3 : vector<1x128xf32> to vector<8x128xf32>
    %5 = arith.addf %2, %4 : vector<8x128xf32>
    %cst_5 = arith.constant 0.000000e+00 : f32
    %6 = vector.broadcast %cst_5 : f32 to vector<8x128xf32>
    %7 = arith.subf %6, %5 : vector<8x128xf32>
    %8 = math.exp %7 : vector<8x128xf32>
    %cst_6 = arith.constant 1.000000e+00 : f32
    %9 = vector.broadcast %cst_6 : f32 to vector<8x128xf32>
    %10 = arith.addf %9, %8 : vector<8x128xf32>
    %11 = tpu.reciprocal %10 : vector<8x128xf32> -> vector<8x128xf32>
    %c0_7 = arith.constant 0 : index
    %c0_8 = arith.constant 0 : index
    %12 = vector.load %arg3[%c0_7, %c0_8] : memref<8x128xf32, #tpu.memory_space<vmem>>, vector<8x128xf32>
    tpu.vector_store %arg3[%c0_7, %c0_8], %11 {strides = array<i32>} : memref<8x128xf32, #tpu.memory_space<vmem>>, vector<8x128xf32>,
    return
  }
}

</mosaic_0001>

<bundles_post_ra>
// kernel: tpu_custom_call.1
= control target key start
LH: loop header
LB: loop body
LE: loop exit
PB: predicated region body
PF: predicated region fallthrough
CT: control target
= control target key end

     0   :  { %8 = vsyncpa [#allocation3], 0  ;;  %s237_s0 = inlined_call_operand.hbm [shape: f32[8,6], index: 0, kind: input, shape index: {}]   ;;  %s238_s1 = inlined_call_operand.hbm [shape: f32[6,128], index: 1, kind: input, shape index: {}]   ;;  %s239_s2 = inlined_call_operand.vmem [shape: f32[1,128], index: 2, kind: input, shape index: {}]   ;;  %s240_s3 = inlined_call_operand.hbm [shape: f32[8,128], index: 3, kind: output, shape index: {}]  }
   0x1   :  { %9 = vsyncpa [#allocation6], 0 }
   0x2   :  { %10 = vsyncpa [#allocation4], 0  ;;  %s16_s14 = sshll.u32 %s237_s0, 4  ;;  %s202_s15 = smov [#allocation2]   ;;  %s17_s14 = int_to_ptr.hbm [resolvable:$true] %s16_s14 }
   0x3   :  { %s18_s16 = sshll.u32 %s202_s15, 4  ;;  %s27_s19 = sshll.u32 %s238_s1, 4  ;;  %s19_s16 = int_to_ptr.vmem [resolvable:$true] %s18_s16  ;;  %s28_s19 = int_to_ptr.hbm [resolvable:$true] %s27_s19 }
   0x4   :  { %21 = dma.hbm_to_vmem [thread:$0]  %s17_s14, 128, %s19_s16, [#allocation3]  }
   0x5   :  { %s203_s20 = smov [#allocation5]  }
   0x6   :  { %s29_s21 = sshll.u32 %s203_s20, 4  ;;  %s30_s21 = int_to_ptr.vmem [resolvable:$true] %s29_s21 }
   0x7   :  { %32 = dma.hbm_to_vmem [thread:$0]  %s28_s19, 128, %s30_s21, [#allocation6]  }
   0x8   :  { %196 = dma.done.wait [#allocation3], 128  }
   0x9   :  { %197 = vsyncadd [#allocation3], 4294967168 }
   0xa   :  { %198 = dma.done.wait [#allocation6], 128  }
   0xb   :  { %199 = vsyncadd [#allocation6], 4294967168  ;;  %vm53_vm0 = vcmask 1045504   ;;  %vm49_vm1 = vcmask 48128   ;;  %v44_v0 = vld [vmem:[#allocation5] sm:$0x3f] }
   0xc   :  { %v43_v1 = vld [vmem:[#allocation2] sm:$0xff]  ;;  %114 = vmatpush.msk.msra.mxu0 %vm53_vm0, %v44_v0  ;;  %s204_s1 = smov [#allocation7]  }
   0xd   :  { %115 = vmatmul.msk.f32.vlgmr.msra.gmra.mxu0 %vm49_vm1, %v43_v1  ;;  %v119_v2 = vld [vmem:[%s239_s2] ss:$0 sm:$0xff]  ;;  %s101_s23 = sshll.u32 %s204_s1, 4  ;;  %s103_s2 = sshll.u32 %s240_s3, 4  ;;  %s102_s23 = int_to_ptr.vmem [resolvable:$true] %s101_s23  ;;  %s104_s2 = int_to_ptr.hbm [resolvable:$true] %s103_s2 }
  0x8a   :  { %v74_v3 = vpop.f32.mrf.mxu0 }
  0x8b   :  { %v75_v4 = vadd.f32 %v119_v2, %v74_v3 }
  0x8d   :  { %v77_v5 = vsub.f32 0.0, %v75_v4 }
  0x8f   :  { %v78_v6 = vmul.f32 1.442695, %v77_v5 }
  0x91   :  { %120 = vpow2.f32 %v78_v6 }
  0x97   :  { %v121_v7 = vpop.eup %120 }
  0x98   :  { %v80_v8 = vadd.f32 1.0, %v121_v7 }
  0x9a   :  { %122 = vrcp.f32 %v80_v8  ;;  %v92_v12 = vand.u32 2147483648, %v80_v8  ;;  %v90_v14 = vand.u32 2147483647, %v80_v8  ;;  %vm86_vm3 = vweird.f32 %v80_v8 }
  0x9c   :  { %v93_v16 = vor.u32 1.1754944e-38, %v92_v12  ;;  %vm91_vm5 = vcmp.eq.f32.partialorder %v90_v14, 8.507059e+37 }
  0xa0   :  { %v123_v9 = vpop.eup %122 }
  0xa1   :  { %v82_v10 = vmul.f32 %v123_v9, %v80_v8  ;;  %vm87_vm2 = vweird.f32 %v123_v9 }
  0xa2   :  { %vm88_vm4 = vmor %vm86_vm3, %vm87_vm2 }
  0xa3   :  { %v83_v11 = vsub.f32 1.0, %v82_v10 }
  0xa5   :  { %v84_v13 = vmul.f32 %v123_v9, %v83_v11 }
  0xa7   :  { %v85_v15 = vadd.f32 %v123_v9, %v84_v13 }
  0xa9   :  { %v89_v17 = vsel %vm88_vm4, %v123_v9, %v85_v15 }
  0xaa   :  { %v94_v18 = vsel %vm91_vm5, %v93_v16, %v89_v17 }
  0xab   :  { %95 = vst [vmem:[#allocation7] sm:$0xff] %v94_v18 }
  0xac   :  { %106 = dma.vmem_to_hbm [thread:$0]  %s102_s23, 128, %s104_s2, [#allocation4]  }
  0xad   :  { %200 = dma.done.wait [#allocation4], 128  }
  0xae   :  { %201 = vsyncadd [#allocation4], 4294967168 }
  0xaf   :  { %111 = vsyncpa [#allocation3], 1 }
  0xb0   :  { %112 = vsyncpa [#allocation6], 1 }
  0xb1   :  { %113 = vsyncpa [#allocation4], 1 }

</bundles_post_ra>
